<compile_context>
chip_gen: v7x
topology: tpu7x:2x2x1
jax: 0.10.0
libtpu: 0.0.40
codegen_flags: <defaults>
</compile_context>

<pallas_src>
import functools

import jax
import jax.numpy as jnp
from jax.experimental import pallas as pl
from jax.experimental.pallas import tpu as pltpu


# --------------------------------------------------------------------------- #
# Kernel
# --------------------------------------------------------------------------- #
def q_kernel(xh_ref, h_ref, enc_ref,
             wxh_ref, wctx_ref, bgru_ref, wq_ref, bq_ref,
             q_ref, hout_ref, *, scale, hidden):
    H = hidden

    # --- GRU gates, x/h half: independent of attention -> overlaps with it ---
    gates_xh = jnp.dot(xh_ref[...].astype(jnp.bfloat16), wxh_ref[...],
                       preferred_element_type=jnp.float32)            # (bb, 4H)

    # --- dec: scaled dot-product attention (VPU mul + XLU reduce + EUP) ------
    h = h_ref[...]                                                    # (bb, H) f32
    enc = enc_ref[...].astype(jnp.float32)                            # (bb, S, H)
    hs = h * scale                                                    # scale once
    scores = jnp.sum(hs[:, None, :] * enc, axis=-1, keepdims=True)    # (bb, S, 1)
    m = jnp.max(scores, axis=1, keepdims=True)                        # (bb, 1, 1)
    p = jnp.exp(scores - m)
    attn = p * pl.reciprocal(jnp.sum(p, axis=1, keepdims=True), approx=True)
    ctx = jnp.sum(attn * enc, axis=1)                                 # (bb, H)

    # --- dec: GRU cell; gate columns packed as [r_pre | z_pre | n_i | n_h] ---
    gates = (gates_xh
             + jnp.dot(ctx.astype(jnp.bfloat16), wctx_ref[...],
                       preferred_element_type=jnp.float32)
             + bgru_ref[...])                                         # (bb, 4H)
    r = jax.nn.sigmoid(gates[:, 0 * H:1 * H])
    z = jax.nn.sigmoid(gates[:, 1 * H:2 * H])
    n = jnp.tanh(gates[:, 2 * H:3 * H] + r * gates[:, 3 * H:4 * H])
    h_new = (1.0 - z) * n + z * h                                     # (bb, H)

    # --- dual: dueling head — V, advantage and mean-subtract pre-folded ------
    q = (jnp.dot(h_new.astype(jnp.bfloat16), wq_ref[...],
                 preferred_element_type=jnp.float32) + bq_ref[...])   # (bb, A)

    q_ref[...] = q.astype(q_ref.dtype)
    hout_ref[...] = h_new.astype(hout_ref.dtype)


# --------------------------------------------------------------------------- #
# One-time parameter fusion (dense packing, r/z fusion, head folding)
# --------------------------------------------------------------------------- #
def prepare_q_params(params, *, param_dtype=jnp.bfloat16):
    """Fuse GRU/head weights into the dense packed layout used by the kernel."""
    E, three_h = params['wix'].shape
    H = three_h // 3
    A = params['wa'].shape[-1]
    sl_r, sl_z, sl_n = slice(0, H), slice(H, 2 * H), slice(2 * H, 3 * H)

    # Rows [x | h], columns [r_pre | z_pre | n_i | n_h]  (each block H wide).
    w_xh = jnp.zeros((E + H, 4 * H), jnp.float32)
    w_xh = w_xh.at[:E, 0 * H:1 * H].set(params['wix'][:, sl_r])
    w_xh = w_xh.at[:E, 1 * H:2 * H].set(params['wix'][:, sl_z])
    w_xh = w_xh.at[:E, 2 * H:3 * H].set(params['wix'][:, sl_n])
    w_xh = w_xh.at[E:, 0 * H:1 * H].set(params['wh'][:, sl_r])
    w_xh = w_xh.at[E:, 1 * H:2 * H].set(params['wh'][:, sl_z])
    w_xh = w_xh.at[E:, 3 * H:4 * H].set(params['wh'][:, sl_n])

    # ctx contributes to the input-side gates only.
    w_ctx = jnp.zeros((H, 4 * H), jnp.float32)
    w_ctx = w_ctx.at[:, 0 * H:1 * H].set(params['wic'][:, sl_r])
    w_ctx = w_ctx.at[:, 1 * H:2 * H].set(params['wic'][:, sl_z])
    w_ctx = w_ctx.at[:, 2 * H:3 * H].set(params['wic'][:, sl_n])

    b_gru = jnp.zeros((1, 4 * H), jnp.float32)
    b_gru = b_gru.at[:, 0 * H:1 * H].set(params['bi'][:, sl_r] + params['bh'][:, sl_r])
    b_gru = b_gru.at[:, 1 * H:2 * H].set(params['bi'][:, sl_z] + params['bh'][:, sl_z])
    b_gru = b_gru.at[:, 2 * H:3 * H].set(params['bi'][:, sl_n])
    b_gru = b_gru.at[:, 3 * H:4 * H].set(params['bh'][:, sl_n])

    # Dueling head folded into one matmul:
    #   Q = V + A - mean(A) = h_new @ (wa @ C + wv 1^T) + (ba @ C + bv),
    # with C = I - (1/A) * ones  (centering matrix).
    C = jnp.eye(A, dtype=jnp.float32) - 1.0 / A
    w_q = params['wa'].astype(jnp.float32) @ C + params['wv'].astype(jnp.float32)
    b_q = params['ba'].astype(jnp.float32) @ C + params['bv'].astype(jnp.float32)

    return dict(w_xh=w_xh.astype(param_dtype),
                w_ctx=w_ctx.astype(param_dtype),
                b_gru=b_gru,                       # biases stay f32 (tiny)
                w_q=w_q.astype(param_dtype),
                b_q=b_q)


# --------------------------------------------------------------------------- #
# Wrapper
# --------------------------------------------------------------------------- #
def q_forward(x, h, enc, fused, *, batch_block=None):
    B, E = x.shape
    _, H = h.shape
    S = enc.shape[1]
    A = fused['w_q'].shape[1]
    assert fused['w_xh'].shape == (E + H, 4 * H)
    assert fused['w_ctx'].shape == (H, 4 * H)

    # [x | h] slab built outside the kernel (removes the in-kernel concat).
    xh = jnp.concatenate([x.astype(jnp.float32), h.astype(jnp.float32)], axis=-1)
    h32 = h.astype(jnp.float32)
    enc_c = enc.astype(fused['w_xh'].dtype)        # bf16 storage halves enc DMA

    # Default: one big batch block (single grid step, best on v5e/v6e).
    # On v7x pass batch_block = multiple of 8 dividing B to use both TCs.
    bb = B if batch_block is None else batch_block
    assert B % bb == 0, "batch_block must divide B (avoid garbage tail blocks)"
    grid = (pl.cdiv(B, bb),)

    kernel = functools.partial(q_kernel, scale=1.0 / float(H) ** 0.5, hidden=H)

    rep = lambda i: (0, 0)                         # weights replicated over grid
    in_specs = [
        pl.BlockSpec((bb, E + H), lambda i: (i, 0)),        # xh
        pl.BlockSpec((bb, H), lambda i: (i, 0)),            # h
        pl.BlockSpec((bb, S, H), lambda i: (i, 0, 0)),      # enc
        pl.BlockSpec((E + H, 4 * H), rep),                  # fused GRU W (x|h rows)
        pl.BlockSpec((H, 4 * H), rep),                      # fused GRU W (ctx rows)
        pl.BlockSpec((1, 4 * H), rep),                      # fused GRU bias
        pl.BlockSpec((H, A), rep),                          # folded head W
        pl.BlockSpec((1, A), rep),                          # folded head bias
    ]
    out_specs = (
        pl.BlockSpec((bb, A), lambda i: (i, 0)),            # Q values
        pl.BlockSpec((bb, H), lambda i: (i, 0)),            # new hidden state
    )
    out_shape = (jax.ShapeDtypeStruct((B, A), jnp.float32),
                 jax.ShapeDtypeStruct((B, H), jnp.float32))

    q_vals, h_new = pl.pallas_call(
        kernel,
        grid=grid,
        in_specs=in_specs,
        out_specs=out_specs,
        out_shape=out_shape,
        compiler_params=pltpu.CompilerParams(
            dimension_semantics=("parallel",)),
    )(xh, h32, enc_c, fused['w_xh'], fused['w_ctx'], fused['b_gru'],
      fused['w_q'], fused['b_q'])
    return q_vals, h_new


# --------------------------------------------------------------------------- #
# Pure-JAX reference (un-fused, f32 parameters)
# --------------------------------------------------------------------------- #
def q_reference(x, h, enc, params):
    H = h.shape[-1]
    scores = jnp.einsum('bh,bsh->bs', h, enc) / jnp.sqrt(jnp.float32(H))
    attn = jax.nn.softmax(scores, axis=-1)
    ctx = jnp.einsum('bs,bsh->bh', attn, enc)
    gi = x @ params['wix'] + ctx @ params['wic'] + params['bi']
    gh = h @ params['wh'] + params['bh']
    i_r, i_z, i_n = gi[:, :H], gi[:, H:2 * H], gi[:, 2 * H:]
    h_r, h_z, h_n = gh[:, :H], gh[:, H:2 * H], gh[:, 2 * H:]
    r = jax.nn.sigmoid(i_r + h_r)
    z = jax.nn.sigmoid(i_z + h_z)
    n = jnp.tanh(i_n + r * h_n)
    h_new = (1.0 - z) * n + z * h
    v = h_new @ params['wv'] + params['bv']
    adv = h_new @ params['wa'] + params['ba']
    q = v + adv - jnp.mean(adv, axis=-1, keepdims=True)
    return q, h_new


if __name__ == "__main__":
    B, S, E, H, A = 4, 8, 32, 32, 8   # batch, seq, input dim, hidden, actions

    key = jax.random.PRNGKey(0)
    ks = jax.random.split(key, 12)
    wscale = 0.1

    x = jax.random.normal(ks[0], (B, E), jnp.float32)
    h0 = jax.random.normal(ks[1], (B, H), jnp.float32)
    enc = jax.random.normal(ks[2], (B, S, H), jnp.float32)

    params = {
        'wix': wscale * jax.random.normal(ks[3], (E, 3 * H), jnp.float32),
        'wic': wscale * jax.random.normal(ks[4], (H, 3 * H), jnp.float32),
        'wh':  wscale * jax.random.normal(ks[5], (H, 3 * H), jnp.float32),
        'bi':  wscale * jax.random.normal(ks[6], (1, 3 * H), jnp.float32),
        'bh':  wscale * jax.random.normal(ks[7], (1, 3 * H), jnp.float32),
        'wv':  wscale * jax.random.normal(ks[8], (H, 1), jnp.float32),
        'bv':  wscale * jax.random.normal(ks[9], (1, 1), jnp.float32),
        'wa':  wscale * jax.random.normal(ks[10], (H, A), jnp.float32),
        'ba':  wscale * jax.random.normal(ks[11], (1, A), jnp.float32),
    }

    fused = prepare_q_params(params)          # one-time fuse / dense pack / bf16
    q_fn = jax.jit(q_forward)

    values, states = q_fn(x, h0, enc, fused)
    jax.block_until_ready((values, states))

    ref_values, ref_states = q_reference(x, h0, enc, params)
    assert values.shape == (B, A) and states.shape == (B, H)
    # bf16 weight/enc storage + approx reciprocal in softmax -> loosened f32 tol
    assert jnp.allclose(values, ref_values, atol=3e-2, rtol=2e-2)
    assert jnp.allclose(states, ref_states, atol=3e-2, rtol=2e-2)

    print("KERNEL_OK")
</pallas_src>

<mosaic_0001>
module attributes {stable_mosaic.version = 11 : i64} {
  func.func @q_kernel(%arg0: i32, %arg1: memref<4x64xf32, #tpu.memory_space<vmem>>, %arg2: memref<4x32xf32, #tpu.memory_space<vmem>>, %arg3: memref<4x8x32xbf16, #tpu.memory_space<vmem>>, %arg4: memref<64x128xbf16, #tpu.memory_space<vmem>>, %arg5: memref<32x128xbf16, #tpu.memory_space<vmem>>, %arg6: memref<1x128xf32, #tpu.memory_space<vmem>>, %arg7: memref<32x8xbf16, #tpu.memory_space<vmem>>, %arg8: memref<1x8xf32, #tpu.memory_space<vmem>>, %arg9: memref<4x8xf32, #tpu.memory_space<vmem>>, %arg10: memref<4x32xf32, #tpu.memory_space<vmem>>) attributes {dimension_semantics = [#tpu.dimension_semantics<parallel>], iteration_bounds = array<i64: 1>, scalar_prefetch = 0 : i64, scratch_operands = 0 : i64, tpu.core_type = #tpu.core_type<tc>, window_params = [{transform_indices = @transform_0, window_bounds = array<i64: 4, 64>}, {transform_indices = @transform_1, window_bounds = array<i64: 4, 32>}, {transform_indices = @transform_2, window_bounds = array<i64: 4, 8, 32>}, {pipeline_mode = #tpu.pipeline_mode<synchronous>, transform_indices = @transform_3, window_bounds = array<i64: 64, 128>}, {pipeline_mode = #tpu.pipeline_mode<synchronous>, transform_indices = @transform_4, window_bounds = array<i64: 32, 128>}, {pipeline_mode = #tpu.pipeline_mode<synchronous>, transform_indices = @transform_5, window_bounds = array<i64: 1, 128>}, {pipeline_mode = #tpu.pipeline_mode<synchronous>, transform_indices = @transform_6, window_bounds = array<i64: 32, 8>}, {pipeline_mode = #tpu.pipeline_mode<synchronous>, transform_indices = @transform_7, window_bounds = array<i64: 1, 8>}, {transform_indices = @transform_8, window_bounds = array<i64: 4, 8>}, {transform_indices = @transform_9, window_bounds = array<i64: 4, 32>}]} {
    %c0 = arith.constant 0 : index
    %c0_0 = arith.constant 0 : index
    %0 = vector.load %arg1[%c0, %c0_0] : memref<4x64xf32, #tpu.memory_space<vmem>>, vector<4x64xf32>
    %1 = arith.truncf %0 : vector<4x64xf32> to vector<4x64xbf16>
    %c0_1 = arith.constant 0 : index
    %c0_2 = arith.constant 0 : index
    %2 = vector.load %arg4[%c0_1, %c0_2] : memref<64x128xbf16, #tpu.memory_space<vmem>>, vector<64x128xbf16>
    %cst = arith.constant dense<0.000000e+00> : vector<4x128xf32>
    %3 = tpu.matmul %1, %2, %cst {dimension_numbers = #tpu.dot_dimension_numbers<[1], [0], [0], [1], [0, 0, 1, 1], [], []>} : vector<4x64xbf16>, vector<64x128xbf16>, vector<4x128xf32> -> vector<4x128xf32>
    %c0_3 = arith.constant 0 : index
    %c0_4 = arith.constant 0 : index
    %4 = vector.load %arg2[%c0_3, %c0_4] : memref<4x32xf32, #tpu.memory_space<vmem>>, vector<4x32xf32>
    %c0_5 = arith.constant 0 : index
    %c0_6 = arith.constant 0 : index
    %c0_7 = arith.constant 0 : index
    %5 = vector.load %arg3[%c0_5, %c0_6, %c0_7] : memref<4x8x32xbf16, #tpu.memory_space<vmem>>, vector<4x8x32xbf16>
    %6 = arith.extf %5 : vector<4x8x32xbf16> to vector<4x8x32xf32>
    %cst_8 = arith.constant 0.176776692 : f32
    %7 = vector.broadcast %cst_8 : f32 to vector<4x32xf32>
    %8 = arith.mulf %4, %7 : vector<4x32xf32>
    %9 = vector.shape_cast %8 : vector<4x32xf32> to vector<4x1x32xf32>
    %10 = vector.broadcast %9 : vector<4x1x32xf32> to vector<4x8x32xf32>
    %11 = arith.mulf %10, %6 : vector<4x8x32xf32>
    %cst_9 = arith.constant dense<0.000000e+00> : vector<4x8xf32>
    %12 = vector.multi_reduction <add>, %11, %cst_9 [2] : vector<4x8x32xf32> to vector<4x8xf32>
    %13 = vector.shape_cast %12 : vector<4x8xf32> to vector<4x8x1xf32>
    %cst_10 = arith.constant dense<0xFF800000> : vector<4x1xf32>
    %14 = vector.multi_reduction <maximumf>, %13, %cst_10 [1] : vector<4x8x1xf32> to vector<4x1xf32>
    %15 = vector.shape_cast %14 : vector<4x1xf32> to vector<4x1x1xf32>
    %16 = vector.broadcast %15 : vector<4x1x1xf32> to vector<4x8x1xf32>
    %17 = arith.subf %13, %16 : vector<4x8x1xf32>
    %18 = math.exp %17 : vector<4x8x1xf32>
    %cst_11 = arith.constant dense<0.000000e+00> : vector<4x1xf32>
    %19 = vector.multi_reduction <add>, %18, %cst_11 [1] : vector<4x8x1xf32> to vector<4x1xf32>
    %20 = vector.shape_cast %19 : vector<4x1xf32> to vector<4x1x1xf32>
    %21 = tpu.reciprocal %20 {approx = true} : vector<4x1x1xf32> -> vector<4x1x1xf32>
    %22 = vector.broadcast %21 : vector<4x1x1xf32> to vector<4x8x1xf32>
    %23 = arith.mulf %18, %22 : vector<4x8x1xf32>
    %24 = vector.broadcast %23 : vector<4x8x1xf32> to vector<4x8x32xf32>
    %25 = arith.mulf %24, %6 : vector<4x8x32xf32>
    %cst_12 = arith.constant dense<0.000000e+00> : vector<4x32xf32>
    %26 = vector.multi_reduction <add>, %25, %cst_12 [1] : vector<4x8x32xf32> to vector<4x32xf32>
    %27 = arith.truncf %26 : vector<4x32xf32> to vector<4x32xbf16>
    %c0_13 = arith.constant 0 : index
    %c0_14 = arith.constant 0 : index
    %28 = vector.load %arg5[%c0_13, %c0_14] : memref<32x128xbf16, #tpu.memory_space<vmem>>, vector<32x128xbf16>
    %cst_15 = arith.constant dense<0.000000e+00> : vector<4x128xf32>
    %29 = tpu.matmul %27, %28, %cst_15 {dimension_numbers = #tpu.dot_dimension_numbers<[1], [0], [0], [1], [0, 0, 1, 1], [], []>} : vector<4x32xbf16>, vector<32x128xbf16>, vector<4x128xf32> -> vector<4x128xf32>
    %30 = arith.addf %3, %29 : vector<4x128xf32>
    %c0_16 = arith.constant 0 : index
    %c0_17 = arith.constant 0 : index
    %31 = vector.load %arg6[%c0_16, %c0_17] : memref<1x128xf32, #tpu.memory_space<vmem>>, vector<1x128xf32>
    %32 = vector.broadcast %31 : vector<1x128xf32> to vector<4x128xf32>
    %33 = arith.addf %30, %32 : vector<4x128xf32>
    %34 = vector.extract_strided_slice %33 {offsets = [0, 0], sizes = [4, 32], strides = [1, 1]} : vector<4x128xf32> to vector<4x32xf32>
    %35 = arith.negf %34 : vector<4x32xf32>
    %36 = math.exp %35 : vector<4x32xf32>
    %cst_18 = arith.constant 1.000000e+00 : f32
    %37 = vector.broadcast %cst_18 : f32 to vector<4x32xf32>
    %38 = arith.addf %37, %36 : vector<4x32xf32>
    %39 = arith.divf %37, %38 : vector<4x32xf32>
    %40 = vector.extract_strided_slice %33 {offsets = [0, 32], sizes = [4, 32], strides = [1, 1]} : vector<4x128xf32> to vector<4x32xf32>
    %41 = arith.negf %40 : vector<4x32xf32>
    %42 = math.exp %41 : vector<4x32xf32>
    %cst_19 = arith.constant 1.000000e+00 : f32
    %43 = vector.broadcast %cst_19 : f32 to vector<4x32xf32>
    %44 = arith.addf %43, %42 : vector<4x32xf32>
    %45 = arith.divf %43, %44 : vector<4x32xf32>
    %46 = vector.extract_strided_slice %33 {offsets = [0, 64], sizes = [4, 32], strides = [1, 1]} : vector<4x128xf32> to vector<4x32xf32>
    %47 = vector.extract_strided_slice %33 {offsets = [0, 96], sizes = [4, 32], strides = [1, 1]} : vector<4x128xf32> to vector<4x32xf32>
    %48 = arith.mulf %39, %47 : vector<4x32xf32>
    %49 = arith.addf %46, %48 : vector<4x32xf32>
    %50 = math.tanh %49 : vector<4x32xf32>
    %cst_20 = arith.constant 1.000000e+00 : f32
    %51 = vector.broadcast %cst_20 : f32 to vector<4x32xf32>
    %52 = arith.subf %51, %45 : vector<4x32xf32>
    %53 = arith.mulf %52, %50 : vector<4x32xf32>
    %54 = arith.mulf %45, %4 : vector<4x32xf32>
    %55 = arith.addf %53, %54 : vector<4x32xf32>
    %56 = arith.truncf %55 : vector<4x32xf32> to vector<4x32xbf16>
    %c0_21 = arith.constant 0 : index
    %c0_22 = arith.constant 0 : index
    %57 = vector.load %arg7[%c0_21, %c0_22] : memref<32x8xbf16, #tpu.memory_space<vmem>>, vector<32x8xbf16>
    %cst_23 = arith.constant dense<0.000000e+00> : vector<4x8xf32>
    %58 = tpu.matmul %56, %57, %cst_23 {dimension_numbers = #tpu.dot_dimension_numbers<[1], [0], [0], [1], [0, 0, 1, 1], [], []>} : vector<4x32xbf16>, vector<32x8xbf16>, vector<4x8xf32> -> vector<4x8xf32>
    %c0_24 = arith.constant 0 : index
    %c0_25 = arith.constant 0 : index
    %59 = vector.load %arg8[%c0_24, %c0_25] : memref<1x8xf32, #tpu.memory_space<vmem>>, vector<1x8xf32>
    %60 = vector.broadcast %59 : vector<1x8xf32> to vector<4x8xf32>
    %61 = arith.addf %58, %60 : vector<4x8xf32>
    %c0_26 = arith.constant 0 : index
    %c0_27 = arith.constant 0 : index
    %62 = vector.load %arg9[%c0_26, %c0_27] : memref<4x8xf32, #tpu.memory_space<vmem>>, vector<4x8xf32>
    tpu.vector_store %arg9[%c0_26, %c0_27], %61 {strides = array<i32>} : memref<4x8xf32, #tpu.memory_space<vmem>>, vector<4x8xf32>,
    %c0_28 = arith.constant 0 : index
    %c0_29 = arith.constant 0 : index
    %63 = vector.load %arg10[%c0_28, %c0_29] : memref<4x32xf32, #tpu.memory_space<vmem>>, vector<4x32xf32>
    tpu.vector_store %arg10[%c0_28, %c0_29], %55 {strides = array<i32>} : memref<4x32xf32, #tpu.memory_space<vmem>>, vector<4x32xf32>,
    return
  }
  func.func @transform_0(%arg0: i32) -> (i32, i32) {
    %c0_i32 = arith.constant 0 : i32
    %c0_i32_0 = arith.constant 0 : i32
    return %arg0, %c0_i32 : i32, i32
  }
  func.func @transform_1(%arg0: i32) -> (i32, i32) {
    %c0_i32 = arith.constant 0 : i32
    %c0_i32_0 = arith.constant 0 : i32
    return %arg0, %c0_i32 : i32, i32
  }
  func.func @transform_2(%arg0: i32) -> (i32, i32, i32) {
    %c0_i32 = arith.constant 0 : i32
    %c0_i32_0 = arith.constant 0 : i32
    %c0_i32_1 = arith.constant 0 : i32
    return %arg0, %c0_i32, %c0_i32_0 : i32, i32, i32
  }
  func.func @transform_3(%arg0: i32) -> (i32, i32) {
    %c0_i32 = arith.constant 0 : i32
    %c0_i32_0 = arith.constant 0 : i32
    %c0_i32_1 = arith.constant 0 : i32
    return %c0_i32, %c0_i32_0 : i32, i32
  }
  func.func @transform_4(%arg0: i32) -> (i32, i32) {
    %c0_i32 = arith.constant 0 : i32
    %c0_i32_0 = arith.constant 0 : i32
    %c0_i32_1 = arith.constant 0 : i32
    return %c0_i32, %c0_i32_0 : i32, i32
  }
  func.func @transform_5(%arg0: i32) -> (i32, i32) {
    %c0_i32 = arith.constant 0 : i32
    %c0_i32_0 = arith.constant 0 : i32
    %c0_i32_1 = arith.constant 0 : i32
    return %c0_i32, %c0_i32_0 : i32, i32
  }
  func.func @transform_6(%arg0: i32) -> (i32, i32) {
    %c0_i32 = arith.constant 0 : i32
    %c0_i32_0 = arith.constant 0 : i32
    %c0_i32_1 = arith.constant 0 : i32
    return %c0_i32, %c0_i32_0 : i32, i32
  }
  func.func @transform_7(%arg0: i32) -> (i32, i32) {
    %c0_i32 = arith.constant 0 : i32
    %c0_i32_0 = arith.constant 0 : i32
    %c0_i32_1 = arith.constant 0 : i32
    return %c0_i32, %c0_i32_0 : i32, i32
  }
  func.func @transform_8(%arg0: i32) -> (i32, i32) {
    %c0_i32 = arith.constant 0 : i32
    %c0_i32_0 = arith.constant 0 : i32
    return %arg0, %c0_i32 : i32, i32
  }
  func.func @transform_9(%arg0: i32) -> (i32, i32) {
    %c0_i32 = arith.constant 0 : i32
    %c0_i32_0 = arith.constant 0 : i32
    return %arg0, %c0_i32 : i32, i32
  }
}

</mosaic_0001>

<bundles_post_ra>
// kernel: q_forward.1
= control target key start
LH: loop header
LB: loop body
LE: loop exit
PB: predicated region body
PF: predicated region fallthrough
CT: control target
= control target key end

     0   :  { %15 = vsyncpa [#allocation3], 0  ;;  %v58_v1 = vlaneseq  ;;  %v653_v3 = vmov 1966171168   ;;  %s829_s0 = inlined_call_operand.vmem [shape: f32[4,64], index: 0, kind: input, shape index: {}]   ;;  %s830_s1 = inlined_call_operand.vmem [shape: f32[4,32], index: 1, kind: input, shape index: {}]   ;;  %s831_s2 = inlined_call_operand.vmem [shape: bf16[4,8,32], index: 2, kind: input, shape index: {}]   ;;  %s832_s3 = inlined_call_operand.vmem [shape: bf16[64,128], index: 3, kind: input, shape index: {}]   ;;  %s833_s4 = inlined_call_operand.vmem [shape: bf16[32,128], index: 4, kind: input, shape index: {}]   ;;  %s834_s5 = inlined_call_operand.vmem [shape: f32[1,128], index: 5, kind: input, shape index: {}]   ;;  %s835_s6 = inlined_call_operand.vmem [shape: bf16[32,8], index: 6, kind: input, shape index: {}]   ;;  %s836_s7 = inlined_call_operand.vmem [shape: f32[1,8], index: 7, kind: input, shape index: {}]   ;;  %s837_s8 = inlined_call_operand.hbm [shape: f32[4,8], index: 8, kind: output, shape index: {0}]   ;;  %s838_s9 = inlined_call_operand.hbm [shape: f32[4,32], index: 9, kind: output, shape index: {1}]  }
   0x1   :  { %v714_v0 = vld [vmem:[%s830_s1] sm:$0xf]  ;;  %v56_v4 = vunpack.c.l.s4 %v653_v3 }
   0x2   :  { %v53_v2 = vmul.f32 0.17677669, %v714_v0  ;;  %v59_v5 = vshrl.u32 %v58_v1, 7  ;;  %v720_v7 = vld [vmem:[%s831_s2] sm:$0xff]  }
   0x3   :  { %v57_v6 = vunpack.c.0.s8 %v56_v4 }
   0x4   :  { %v81_v8 = vsub.s32 0, %v59_v5 }
   0x5   :  { %v60_v9 = vsub.s32 %v57_v6, %v59_v5 }
   0x7   :  { %v61_v10 = vrot.slane %v53_v2, %v60_v9 }
   0x8   :  { %16 = vsyncpa [#allocation5], 0  ;;  %v725_v11 = vld [vmem:[%s831_s2 + $0x8] sm:$0xff]   ;;  %v521_v12 = vunpack.c.l.bf16 %v720_v7  ;;  %v522_v15 = vunpack.c.h.bf16 %v720_v7  ;;  %vm103_vm0 = vcmask 261120   ;;  %v575_v33 = vld [vmem:[%s832_s3] sm:$0xff]   ;;  %v654_v34 = vmov 0.0  }
   0x9   :  { %v69_v13 = vrot.slane %v61_v10, %v60_v9  ;;  %v62_v14 = vcombine.high %v61_v10, %v61_v10  ;;  %v525_v17 = vunpack.c.l.bf16 %v725_v11  ;;  %v526_v20 = vunpack.c.h.bf16 %v725_v11  ;;  %547 = vmatprep.subr.bf16.mxu1 %v654_v34  ;;  %539 = vmatprep.subr.bf16.mxu0 %v654_v34  ;;  %v578_v35 = vld [vmem:[%s833_s4] sm:$0xff]   ;;  %v576_v36 = vld [vmem:[%s832_s3 + $0x8] sm:$0xff]   ;;  %v577_v38 = vld [vmem:[%s832_s3 + $0x10] sm:$0xff]   ;;  %s656_s26 = smov 32   ;;  %s657_s27 = smov 64  }
   0xa   :  { %548 = vmatpush3.bf16.msra.mxu1 %v575_v33  ;;  %vm655_vm1 = vmmov 0   ;;  %540 = vmatpush3.bf16.msra.mxu0 %v578_v35  ;;  %v580_v37 = vld [vmem:[%s833_s4 + $0x8] sm:$0xff]   ;;  %v579_v39 = vld [vmem:[%s832_s3 + $0x18] sm:$0xff]   ;;  %v34_v40 = vld [vmem:[%s829_s0] sm:$0xf]  ;;  %vm318_vm2 = vcmask 523264  }
   0xb   :  { %v82_v16 = vrot.slane %v69_v13, %v81_v8  ;;  %v77_v18 = vcombine.high %v69_v13, %v69_v13  ;;  %v76_v19 = vrot.slane %v62_v14, %v60_v9  ;;  %555 = vmatprep.mubr.msk.bf16.mxu1 %vm655_vm1, %v654_v34  ;;  %549 = vmatprep.subr.bf16.mxu1 %v654_v34  ;;  %vm232_vm3 = vcmask 1041409   ;;  %s658_s10 = smov 96  }
   0xc   :  { %541 = vmatprep.subr.bf16.mxu0 %v654_v34  ;;  %543 = vmatprep.mubr.msk.bf16.mxu0 %vm655_vm1, %v654_v34  ;;  %v35_v41 = vpack.c.bf16 %v34_v40, %v34_v40  ;;  %vm234_vm4 = vcmask 1042434   ;;  %vm236_vm5 = vcmask 1043459   ;;  %vm475_vm6 = vcmask 257024  }
   0xd   :  { %v99_v21 = vmul.f32 %v521_v12, %v82_v16  ;;  %v90_v22 = vrot.slane %v77_v18, %v81_v8  ;;  %v86_v23 = vrot.slane %v76_v19, %v81_v8  ;;  %v78_v24 = vcombine.high %v76_v19, %v76_v19 }
   0xe   :  { %550 = vmatpush3.bf16.msra.mxu1 %v576_v36  ;;  %542 = vmatpush3.bf16.msra.mxu0 %v580_v37 }
   0xf   :  { %v104_v25 = vsel %vm103_vm0, %v99_v21, 0.0  ;;  %v101_v26 = vmul.f32 %v525_v17, %v90_v22  ;;  %v100_v27 = vmul.f32 %v522_v15, %v86_v23  ;;  %v94_v28 = vrot.slane %v78_v24, %v81_v8  ;;  %551 = vmatprep.subr.bf16.mxu1 %v654_v34  ;;  %559 = vmatprep.subr.bf16.mxu0 %v654_v34 }
  0x10   :  { %105 = vadd.xlane.f32.xlu0 %v104_v25 }
  0x11   :  { %v110_v29 = vsel %vm103_vm0, %v101_v26, 0.0  ;;  %v107_v30 = vsel %vm103_vm0, %v100_v27, 0.0  ;;  %v102_v31 = vmul.f32 %v526_v20, %v94_v28 }
  0x12   :  { %111 = vadd.xlane.f32.xlu1 %v110_v29  ;;  %552 = vmatpush3.bf16.msra.mxu1 %v577_v38 }
  0x13   :  { %v113_v32 = vsel %vm103_vm0, %v102_v31, 0.0  ;;  %553 = vmatprep.subr.bf16.mxu1 %v654_v34 }
  0x14   :  { %108 = vadd.xlane.f32.xlu0 %v107_v30 }
  0x16   :  { %114 = vadd.xlane.f32.xlu1 %v113_v32  ;;  %554 = vmatpush3.bf16.msra.mxu1 %v579_v39 }
  0x19   :  { %556 = vmatmul.mubr.msk.bf16.vlgmr.msra.gmra.mrb[0].mxu1 %vm318_vm2, %v35_v41 }
  0x9d   :  { %v106_v42 = vpop.xlane.xlu0 %105 }
  0x9e   :  { %v116_v43 = vrot.slane %v106_v42, 4 }
  0x9f   :  { %v112_v44 = vpop.xlane.xlu1 %111 }
  0xa0   :  { %v117_v45 = vmax.f32 %v106_v42, %v116_v43  ;;  %v128_v46 = vrot.slane %v112_v44, 4 }
  0xa1   :  { %v109_v47 = vpop.xlane.xlu0 %108 }
  0xa2   :  { %v118_v48 = vrot.slane %v117_v45, 2  ;;  %v129_v49 = vmax.f32 %v112_v44, %v128_v46  ;;  %v122_v50 = vrot.slane %v109_v47, 4 }
  0xa3   :  { %v115_v51 = vpop.xlane.xlu1 %114 }
  0xa4   :  { %v119_v52 = vmax.f32 %v117_v45, %v118_v48  ;;  %v130_v53 = vrot.slane %v129_v49, 2  ;;  %v123_v54 = vmax.f32 %v109_v47, %v122_v50  ;;  %v134_v55 = vrot.slane %v115_v51, 4 }
  0xa6   :  { %v120_v56 = vrot.slane %v119_v52, 1  ;;  %v131_v57 = vmax.f32 %v129_v49, %v130_v53  ;;  %v124_v58 = vrot.slane %v123_v54, 2  ;;  %v135_v59 = vmax.f32 %v115_v51, %v134_v55 }
  0xa8   :  { %v121_v60 = vmax.f32 %v119_v52, %v120_v56  ;;  %v132_v61 = vrot.slane %v131_v57, 1  ;;  %v125_v62 = vmax.f32 %v123_v54, %v124_v58  ;;  %v136_v63 = vrot.slane %v135_v59, 2 }
  0xaa   :  { %v140_v1 = vsub.f32 %v106_v42, %v121_v60  ;;  %v133_v2 = vmax.f32 %v131_v57, %v132_v61  ;;  %v126_v3 = vrot.slane %v125_v62, 1  ;;  %v137_v4 = vmax.f32 %v135_v59, %v136_v63 }
  0xac   :  { %v144_v5 = vmul.f32 1.442695, %v140_v1  ;;  %v142_v6 = vsub.f32 %v112_v44, %v133_v2  ;;  %v127_v8 = vmax.f32 %v125_v62, %v126_v3  ;;  %v138_v9 = vrot.slane %v137_v4, 1 }
  0xae   :  { %583 = vpow2.f32 %v144_v5  ;;  %v148_v10 = vmul.f32 1.442695, %v142_v6  ;;  %v141_v13 = vsub.f32 %v109_v47, %v127_v8  ;;  %v139_v14 = vmax.f32 %v137_v4, %v138_v9 }
  0xb0   :  { %585 = vpow2.f32 %v148_v10  ;;  %v146_v16 = vmul.f32 1.442695, %v141_v13  ;;  %v143_v18 = vsub.f32 %v115_v51, %v139_v14 }
  0xb2   :  { %587 = vpow2.f32 %v146_v16  ;;  %v150_v19 = vmul.f32 1.442695, %v143_v18 }
  0xb4   :  { %589 = vpow2.f32 %v150_v19 }
  0xb8   :  { %v584_v21 = vpop.eup %583 }
  0xb9   :  { %v152_v22 = vrot.slane %v584_v21, 4 }
  0xba   :  { %v586_v23 = vpop.eup %585 }
  0xbb   :  { %v153_v24 = vadd.f32 %v584_v21, %v152_v22  ;;  %v164_v25 = vrot.slane %v586_v23, 4 }
  0xbc   :  { %v588_v26 = vpop.eup %587 }
  0xbd   :  { %v154_v27 = vrot.slane %v153_v24, 2  ;;  %v165_v28 = vadd.f32 %v586_v23, %v164_v25  ;;  %v158_v29 = vrot.slane %v588_v26, 4 }
  0xbe   :  { %v590_v30 = vpop.eup %589 }
  0xbf   :  { %v155_v31 = vadd.f32 %v154_v27, %v153_v24  ;;  %v166_v32 = vrot.slane %v165_v28, 2  ;;  %v159_v33 = vadd.f32 %v588_v26, %v158_v29  ;;  %v170_v35 = vrot.slane %v590_v30, 4 }
  0xc1   :  { %v156_v36 = vrot.slane %v155_v31, 1  ;;  %v167_v37 = vadd.f32 %v166_v32, %v165_v28  ;;  %v160_v38 = vrot.slane %v159_v33, 2  ;;  %v171_v39 = vadd.f32 %v590_v30, %v170_v35 }
  0xc3   :  { %v157_v40 = vadd.f32 %v156_v36, %v155_v31  ;;  %v168_v41 = vrot.slane %v167_v37, 1  ;;  %v161_v42 = vadd.f32 %v160_v38, %v159_v33  ;;  %v172_v43 = vrot.slane %v171_v39, 2 }
  0xc5   :  { %591 = vrcp.f32 %v157_v40  ;;  %v169_v44 = vadd.f32 %v168_v41, %v167_v37  ;;  %v162_v45 = vrot.slane %v161_v42, 1  ;;  %v173_v46 = vadd.f32 %v172_v43, %v171_v39 }
  0xc7   :  { %593 = vrcp.f32 %v169_v44  ;;  %v163_v47 = vadd.f32 %v162_v45, %v161_v42  ;;  %v174_v48 = vrot.slane %v173_v46, 1  ;;  %v513_v45 = vld [vmem:[%s834_s5] ss:$0 sm:$0xff] }
  0xc9   :  { %595 = vrcp.f32 %v163_v47  ;;  %v175_v49 = vadd.f32 %v174_v48, %v173_v46 }
  0xcb   :  { %597 = vrcp.f32 %v175_v49 }
  0xcf   :  { %v592_v50 = vpop.eup %591 }
  0xd0   :  { %v180_v51 = vmul.f32 %v592_v50, %v584_v21 }
  0xd1   :  { %v594_v52 = vpop.eup %593 }
  0xd2   :  { %v182_v53 = vmul.f32 %v594_v52, %v586_v23  ;;  %v184_v54 = vmul.f32 %v521_v12, %v180_v51 }
  0xd3   :  { %v596_v55 = vpop.eup %595 }
  0xd4   :  { %v181_v56 = vmul.f32 %v596_v55, %v588_v26  ;;  %v186_v57 = vmul.f32 %v525_v17, %v182_v53  ;;  %v188_v58 = vsel %vm103_vm0, %v184_v54, 0.0 }
  0xd5   :  { %v598_v59 = vpop.eup %597  ;;  %v189_v60 = vrot.slane %v188_v58, 4 }
  0xd6   :  { %v183_v61 = vmul.f32 %v598_v59, %v590_v30  ;;  %v185_v62 = vmul.f32 %v522_v15, %v181_v56  ;;  %v202_v63 = vsel %vm103_vm0, %v186_v57, 0.0  ;;  %v581_v59 = vld [vmem:[%s835_s6] sm:$0xff]  }
  0xd7   :  { %v190_v1 = vadd.f32 %v189_v60, %v188_v58  ;;  %v203_v2 = vrot.slane %v202_v63, 4 }
  0xd8   :  { %v187_v12 = vmul.f32 %v526_v20, %v183_v61  ;;  %v195_v3 = vsel %vm103_vm0, %v185_v62, 0.0  ;;  %v582_v61 = vld [vmem:[%s835_s6 + $0x8] sm:$0xff]   ;;  %s659_s6 = smov [#allocation4]  }
  0xd9   :  { %v191_v4 = vrot.slane %v190_v1, 2  ;;  %v196_v5 = vrot.slane %v195_v3, 4  ;;  %v204_v17 = vadd.f32 %v203_v2, %v202_v63  ;;  %s493_s11 = sshll.u32 %s659_s6, 4  ;;  %s494_s11 = int_to_ptr.vmem [resolvable:$true] %s493_s11 }
  0xda   :  { %v209_v6 = vsel %vm103_vm0, %v187_v12, 0.0  ;;  %s605_s12 = scalar_lea.vmem %s494_s11, 64  ;;  %p610_p1 = scmp.lt.s32.totalorder %s494_s11, %s494_s11 }
  0xdb   :  { %v192_v8 = vadd.f32 %v191_v4, %v190_v1  ;;  %v197_v9 = vadd.f32 %v196_v5, %v195_v3  ;;  %v205_v10 = vrot.slane %v204_v17, 2  ;;  %v210_v13 = vrot.slane %v209_v6, 4  ;;  %p606_p0 = scmp.ne.s32.totalorder %s494_s11, %s605_s12  ;;  %p611_p2 = scmp.lt.s32.totalorder %s605_s12, %s605_s12 }
  0xdd   :  { %v193_v7 = vrot.slane %v192_v8, 1  ;;  %v198_v15 = vrot.slane %v197_v9, 2  ;;  %v206_v14 = vadd.f32 %v205_v10, %v204_v17  ;;  %v211_v16 = vadd.f32 %v210_v13, %v209_v6  ;;  %p612_p3 = por %p611_p2, %p610_p1 }
  0xdf   :  { %v194_v18 = vadd.f32 %v193_v7, %v192_v8  ;;  %v199_v19 = vadd.f32 %v198_v15, %v197_v9  ;;  %v207_v21 = vrot.slane %v206_v14, 1  ;;  %v212_v11 = vrot.slane %v211_v16, 2  ;;  %p613_p4 = pnand %p612_p3, %p606_p0 }
  0xe1   :  { %v200_v20 = vrot.slane %v199_v19, 1  ;;  %v208_v22 = vadd.f32 %v207_v21, %v206_v14  ;;  %v213_v23 = vadd.f32 %v212_v11, %v211_v16  ;;  %v216_v26 = vpack.c.bf16 %v194_v18, %v194_v18 }
  0xe3   :  { %v201_v24 = vadd.f32 %v200_v20, %v199_v19  ;;  %v214_v25 = vrot.slane %v213_v23, 1  ;;  %v218_v27 = vpack.c.bf16 %v208_v22, %v208_v22  ;;  %v228_v31 = vunpack.c.l.b16 %v216_v26 }
  0xe5   :  { %v215_v28 = vadd.f32 %v214_v25, %v213_v23  ;;  %v217_v29 = vpack.c.bf16 %v201_v24, %v201_v24  ;;  %v230_v33 = vunpack.c.l.b16 %v218_v27 }
  0xe7   :  { %v219_v30 = vpack.c.bf16 %v215_v28, %v215_v28  ;;  %v229_v32 = vunpack.c.l.b16 %v217_v29 }
  0xe9   :  { %v231_v35 = vunpack.c.l.b16 %v219_v30  ;;  %v233_v36 = vsel %vm232_vm3, %v229_v32, %v228_v31 }
  0xea   :  { %v235_v37 = vsel %vm234_vm4, %v230_v33, %v233_v36 }
  0xeb   :  { %v237_v38 = vsel %vm236_vm5, %v231_v35, %v235_v37 }
  0xec   :  { %v238_v39 = vpack.c.b16 %v237_v38, %v237_v38  ;;  %v356_v40 = vpop.f32.mrb[0].mxu1 }
  0xed   :  { %v557_v41 = vpop.f32.mrb[1].mxu1 }
  0xee   :  { %544 = vmatmul.mubr.msk.bf16.vlgmr.msra.gmra.mrb[0].mxu0 %vm103_vm0, %v238_v39  ;;  %v359_v42 = vpop.f32.mrb[2].mxu1 }
  0xef   :  { %563 = vmatprep.mubr.msk.bf16.mxu0 %vm655_vm1, %v654_v34  ;;  %v558_v43 = vpop.f32.mrb[3].mxu1  ;;  %560 = vmatpush3.bf16.msra.mxu0 %v581_v59 }
  0xf0   :  { %561 = vmatprep.subr.bf16.mxu0 %v654_v34 }
  0xf3   :  { %562 = vmatpush3.bf16.msra.mxu0 %v582_v61 }
 0x1c1   :  { %v288_v44 = vpop.f32.mrb[0].mxu0 }
 0x1c2   :  { %v357_v46 = vadd.f32 %v356_v40, %v288_v44  ;;  %v545_v47 = vpop.f32.mrb[1].mxu0 }
 0x1c3   :  { %v291_v48 = vpop.f32.mrb[2].mxu0 }
 0x1c4   :  { %v369_v49 = vadd.f32 %v513_v45, %v357_v46  ;;  %v546_v50 = vpop.f32.mrb[3].mxu0 }
 0x1c6   :  { %377 = vrot.lane.b32.xlu0 %v369_v49, %s656_s26  ;;  %v514_v51 = vmul.f32 -1.442695, %v369_v49 }
 0x1c8   :  { %599 = vpow2.f32 %v514_v51 }
 0x1d2   :  { %v600_v52 = vpop.eup %599 }
 0x1d3   :  { %v373_v53 = vadd.f32 1.0, %v600_v52 }
 0x1d5   :  { %601 = vrcp.f32 %v373_v53 }
 0x1df   :  { %v602_v54 = vpop.eup %601 }
 0x1e0   :  { %v387_v63 = vsub.f32 1.0, %v602_v54 }
 0x238   :  { %v378_v55 = vpop.permute.xlu0 %377 }
 0x239   :  { %v380_v56 = vmul.f32 %v602_v54, %v378_v55 }
 0x23b   :  { %382 = vrot.lane.b32.xlu1 %v380_v56, %s657_s27 }
 0x2ad   :  { %v383_v57 = vpop.permute.xlu1 %382 }
 0x2ae   :  { %v385_v58 = vadd.f32 %v383_v57, %v369_v49 }
 0x2b0   :  { %603 = vtanh.f32 %v385_v58 }
 0x2ba   :  { %v604_v60 = vpop.eup %603 }
 0x2bb   :  { %389 = vrot.lane.b32.xlu1 %v604_v60, %s658_s10 }
 0x2bf   :  { %394 = vrot.lane.b32.xlu1 %v714_v0, %s656_s26 }
 0x32d   :  { %v390_v62 = vpop.permute.xlu1 %389 }
 0x32e   :  { %v392_v2 = vmul.f32 %v390_v62, %v387_v63 }
 0x331   :  { %v395_v1 = vpop.permute.xlu1 %394 }
 0x332   :  { %v397_v12 = vmul.f32 %v602_v54, %v395_v1 }
 0x334   :  { %v398_v3 = vadd.f32 %v397_v12, %v392_v2 }
 0x336   :  { %472 = vrot.lane.b32.xlu1 %v398_v3, %s658_s10  ;;  %v399_v4 = vpack.c.bf16 %v398_v3, %v398_v3 }
 0x338   :  { %412 = vrot.lane.b32.xlu0 %v399_v4, %s658_s10 }
 0x3a8   :  { %v473_v5 = vpop.permute.xlu1 %472 }
 0x3a9   :  { %476 = vst.msk [vmem:[#allocation4] sm:$0xf] %vm475_vm6, %v473_v5 }
 0x3aa   :  { %v413_v17 = vpop.permute.xlu0 %412 }
 0x3ab   :  { %564 = vmatmul.mubr.msk.bf16.vlgmr.msra.gmra.mrb[4].mxu0 %vm103_vm0, %v413_v17 }
 0x3ac   :  { %616 = shalt.err (!%p613_p4)
}
 0x3ad   :  { %s617_s1 = scalar_lea.hbm %s838_s9, 64 }
 0x3ae   :  { %p618_p5 = scmp.ne.s32.totalorder %s838_s9, %s617_s1  ;;  %p621_p6 = scmp.lt.u32.totalorder %s617_s1, %s838_s9 }
 0x3b0   :  { %p623_p7 = pnand %p621_p6, %p618_p5 }
 0x3b2   :  { %626 = shalt.err (!%p623_p7)
}
 0x3b3   :  { %496 = dma.vmem_to_hbm [thread:$0]  %s494_s11, 64, %s838_s9, [#allocation5]   ;;  %v515_v0 = vld [vmem:[%s836_s7] ss:$0 sm:$0xff]  ;;  %vm469_vm7 = vcmask 60416  }
 0x3b4   :  { %s660_s22 = smov [#allocation2]  }
 0x3b5   :  { %s483_s23 = sshll.u32 %s660_s22, 4  ;;  %s484_s23 = int_to_ptr.vmem [resolvable:$true] %s483_s23 }
 0x3b6   :  { %s627_s24 = scalar_lea.vmem %s484_s23, 64  ;;  %p632_p9 = scmp.lt.s32.totalorder %s484_s23, %s484_s23 }
 0x3b7   :  { %p628_p8 = scmp.ne.s32.totalorder %s484_s23, %s627_s24  ;;  %p633_p10 = scmp.lt.s32.totalorder %s627_s24, %s627_s24 }
 0x3b9   :  { %p634_p11 = por %p633_p10, %p632_p9 }
 0x3bb   :  { %p635_p12 = pnand %p634_p11, %p628_p8 }
 0x47e   :  { %v463_v34 = vpop.f32.mrb[4].mxu0 }
 0x47f   :  { %v464_v6 = vadd.f32 %v515_v0, %v463_v34  ;;  %v565_v8 = vpop.f32.mrb[5].mxu0 }
 0x480   :  { %v466_v9 = vpop.f32.mrb[6].mxu0 }
 0x481   :  { %v566_v10 = vpop.f32.mrb[7].mxu0  ;;  %470 = vst.msk [vmem:[#allocation2] sm:$0xf] %vm469_vm7, %v464_v6 }
 0x482   :  { %638 = shalt.err (!%p635_p12)
}
 0x483   :  { %s639_s7 = scalar_lea.hbm %s837_s8, 64 }
 0x484   :  { %p640_p13 = scmp.ne.s32.totalorder %s837_s8, %s639_s7  ;;  %p643_p0 = scmp.lt.u32.totalorder %s639_s7, %s837_s8 }
 0x486   :  { %p645_p1 = pnand %p643_p0, %p640_p13 }
 0x488   :  { %648 = shalt.err (!%p645_p1)
}
 0x489   :  { %486 = dma.vmem_to_hbm [thread:$0]  %s484_s23, 64, %s837_s8, [#allocation3]  }
 0x48a   :  { %649 = dma.done.wait [#allocation3], 64  }
 0x48b   :  { %650 = vsyncadd [#allocation3], 4294967232 }
 0x48c   :  { %651 = dma.done.wait [#allocation5], 64  }
 0x48d   :  { %652 = vsyncadd [#allocation5], 4294967232 }
 0x48e   :  { %503 = vsyncpa [#allocation3], 1 }
 0x48f   :  { %504 = vsyncpa [#allocation5], 1 }

</bundles_post_ra>
